<compile_context>
chip_gen: v7x
topology: tpu7x:2x2x1
jax: 0.10.0
libtpu: 0.0.40
codegen_flags: <defaults>
</compile_context>

<pallas_src>
import jax
import jax.numpy as jnp
from jax.experimental import pallas as pl
from jax.experimental.pallas import tpu as pltpu

_MIB = 1 << 20


# ---------------------------------------------------------------------------
# Hardware-aware sizing helpers
# ---------------------------------------------------------------------------
def _vmem_capacity_bytes():
    """Per-TensorCore VMEM capacity; conservative fallback if unqueryable."""
    try:
        cap = int(pltpu.get_tpu_info().vmem_capacity_bytes)
        if cap > 0:
            return cap
    except Exception:
        pass
    try:
        kind = jax.devices()[0].device_kind.lower()
        if "v2" in kind or "v3" in kind:
            return 16 * _MIB
        if "v7" in kind:
            return 64 * _MIB
        return 128 * _MIB  # v4 / v5e / v6e
    except Exception:
        return 64 * _MIB


def _tile_budget_bytes(vmem_cap):
    """Budget for the double-buffered in+out whole-image tiles.

    ~56 MiB on 128 MiB chips (v5e/v6e), ~24 MiB on v7x (64 MiB per TC); the
    rest is headroom for weights, in-kernel temporaries and compiler scratch.
    """
    return max(16 * _MIB, min(vmem_cap // 2 - 8 * _MIB, 64 * _MIB))


def _choose_nb(n, per_image_step_bytes, budget_bytes):
    """Images per grid step.

    Returns 0 when even a single image's per-step footprint exceeds the budget
    (caller switches to the HW-tiled two-phase path).
    """
    fit = int(budget_bytes // max(1, per_image_step_bytes))
    if fit < 1:
        return 0
    nb = min(n, fit)
    if n >= 2:
        # Keep >= 2 grid steps so the DMA pipeline overlaps and both v7x
        # TensorCores get work; prefer an even number of steps for balance.
        nb = min(nb, max(1, n // 2))
        best = nb
        for cand in range(nb, max(1, (nb + 1) // 2) - 1, -1):
            if pl.cdiv(n, cand) % 2 == 0:
                best = cand
                break
        nb = best
    return max(1, nb)


# ---------------------------------------------------------------------------
# Main (whole-image tiles) kernel
# ---------------------------------------------------------------------------
def _make_se_kernel(channels_last):
    pool_axis = 1 if channels_last else 2  # reduce over the HW axis

    def kernel(x_ref, wd_ref, bd_ref, wu_ref, bu_ref, o_ref):
        # x_ref: (NB, HW, C) if channels_last else (NB, C, HW)
        x = x_ref[...]
        # squeeze: global average pool, f32 accumulation for the reduce only
        pooled = jnp.mean(x.astype(jnp.float32), axis=pool_axis)       # (NB, C)
        # excite: 1x1 convs == tiny matmuls; gate math stays f32
        h = jnp.dot(pooled, wd_ref[...],
                    preferred_element_type=jnp.float32) + bd_ref[...]   # (NB, I)
        h = jnp.maximum(h, 0.0)
        s = jax.nn.sigmoid(
            jnp.dot(h, wu_ref[...],
                    preferred_element_type=jnp.float32) + bu_ref[...])  # (NB, C)
        # scale: multiply in the INPUT dtype (no full-slab f32 upcast)
        g = s.astype(o_ref.dtype)
        if channels_last:
            o_ref[...] = x * g[:, None, :]                               # (NB, HW, C)
        else:
            o_ref[...] = x * g[:, :, None]                               # (NB, C, HW)

    return kernel


# ---------------------------------------------------------------------------
# Fallback: HW-tiled two-phase path (oversized single-image slabs)
# ---------------------------------------------------------------------------
def _se_hw_tiled(x, wd_t, bd, wu_t, bu, *, budget, vmem_cap, weight_bytes):
    """Phase 1: masked pool + gate over (1, C, THW) tiles (reduction over the
    HW grid axis into a per-image (1, 1, C) f32 output, gate computed at the
    last HW step).  Phase 2: scale pass over the same tiles, both grid axes
    parallel.  Reads x twice but bounds VMEM independently of image size."""
    N, C, H, W = x.shape
    HW = H * W
    I = wd_t.shape[1]
    itemsize = x.dtype.itemsize

    x_flat = x.reshape(N, C, HW)

    # HW tile: a multiple of 128 lanes sized to the budget (in/out double
    # buffers + the f32 masking temporary in the pool pass).
    per_col_bytes = 4 * C * itemsize + 4 * C
    thw = max(128, (int(budget // max(1, per_col_bytes)) // 128) * 128)
    thw = min(thw, pl.cdiv(HW, 128) * 128)
    n_hw = pl.cdiv(HW, thw)

    tile_bytes = C * thw * itemsize
    needed = 4 * tile_bytes + 4 * C * thw + 2 * weight_bytes + 4 * C * 4
    vmem_limit = int(max(32 * _MIB,
                         min(needed + 16 * _MIB, min(96 * _MIB, vmem_cap))))

    inv_hw = 1.0 / float(HW)

    def gate_kernel(x_ref, wd_ref, bd_ref, wu_ref, bu_ref, s_ref):
        hw_idx = pl.program_id(1)

        @pl.when(hw_idx == 0)
        def _():
            s_ref[...] = jnp.zeros_like(s_ref)

        # Mask lanes past HW in the (possibly partial) last tile before summing.
        col = hw_idx * thw + jax.lax.broadcasted_iota(jnp.int32, (1, 1, thw), 2)
        xv = jnp.where(col < HW, x_ref[...].astype(jnp.float32), 0.0)
        s_ref[...] += jnp.sum(xv, axis=-1)[:, None, :]                  # (1, 1, C)

        @pl.when(hw_idx == pl.num_programs(1) - 1)
        def _():
            pooled = s_ref[0] * inv_hw                                  # (1, C)
            h = jnp.maximum(
                jnp.dot(pooled, wd_ref[...],
                        preferred_element_type=jnp.float32) + bd_ref[...], 0.0)
            s = jax.nn.sigmoid(
                jnp.dot(h, wu_ref[...],
                        preferred_element_type=jnp.float32) + bu_ref[...])
            s_ref[...] = s[:, None, :]

    gates = pl.pallas_call(
        gate_kernel,
        out_shape=jax.ShapeDtypeStruct((N, 1, C), jnp.float32),
        grid_spec=pltpu.PrefetchScalarGridSpec(
            num_scalar_prefetch=0,
            grid=(N, n_hw),
            in_specs=[
                pl.BlockSpec((1, C, thw), lambda n, h: (n, 0, h)),
                pl.BlockSpec((C, I), lambda n, h: (0, 0)),
                pl.BlockSpec((1, I), lambda n, h: (0, 0)),
                pl.BlockSpec((I, C), lambda n, h: (0, 0)),
                pl.BlockSpec((1, C), lambda n, h: (0, 0)),
            ],
            out_specs=pl.BlockSpec((1, 1, C), lambda n, h: (n, 0, 0)),
        ),
        compiler_params=pltpu.CompilerParams(
            dimension_semantics=("parallel", "arbitrary"),
            vmem_limit_bytes=vmem_limit,
        ),
        cost_estimate=pl.CostEstimate(
            flops=int(N * C * HW + 4 * N * C * I),
            transcendentals=int(N * C),
            bytes_accessed=int(N * C * HW * itemsize + weight_bytes + N * C * 4),
        ),
    )(x_flat, wd_t, bd, wu_t, bu)

    def scale_kernel(x_ref, s_ref, o_ref):
        g = s_ref[0].astype(o_ref.dtype)                                # (1, C)
        o_ref[...] = x_ref[...] * g[:, :, None]                         # (1, C, THW)

    out_flat = pl.pallas_call(
        scale_kernel,
        out_shape=jax.ShapeDtypeStruct((N, C, HW), x.dtype),
        grid_spec=pltpu.PrefetchScalarGridSpec(
            num_scalar_prefetch=0,
            grid=(N, n_hw),
            in_specs=[
                pl.BlockSpec((1, C, thw), lambda n, h: (n, 0, h)),
                pl.BlockSpec((1, 1, C), lambda n, h: (n, 0, 0)),
            ],
            out_specs=pl.BlockSpec((1, C, thw), lambda n, h: (n, 0, h)),
        ),
        compiler_params=pltpu.CompilerParams(
            dimension_semantics=("parallel", "parallel"),
            vmem_limit_bytes=vmem_limit,
        ),
        cost_estimate=pl.CostEstimate(
            flops=int(N * C * HW),
            transcendentals=0,
            bytes_accessed=int(2 * N * C * HW * itemsize + N * C * 4),
        ),
    )(x_flat, gates)

    return out_flat.reshape(N, C, H, W)


# ---------------------------------------------------------------------------
# Public wrapper
# ---------------------------------------------------------------------------
def se_block(x, w_down, b_down, w_up, b_up, *, vmem_budget_override=None):
    """SEBlock forward.

    x: (N, C, H, W); w_down: (I, C); b_down: (I,); w_up: (C, I); b_up: (C,)
    (Conv2d 1x1 weights squeezed to 2-D).
    """
    N, C, H, W = x.shape
    if H != W:
        raise ValueError(
            "SEBlock (avg_pool2d with kernel_size=W) is a global pool only for "
            f"square inputs; got H={H}, W={W}.")
    I = w_down.shape[0]
    HW = H * W
    itemsize = x.dtype.itemsize

    # Wrapper-side layout plumbing: pre-transposed weights, lane-major biases.
    wd_t = jnp.asarray(w_down, jnp.float32).T.reshape(C, I)
    wu_t = jnp.asarray(w_up, jnp.float32).T.reshape(I, C)
    bd = jnp.asarray(b_down, jnp.float32).reshape(1, I)
    bu = jnp.asarray(b_up, jnp.float32).reshape(1, C)
    weight_bytes = int(wd_t.size + wu_t.size + bd.size + bu.size) * 4

    vmem_cap = _vmem_capacity_bytes()
    budget = (vmem_budget_override if vmem_budget_override is not None
              else _tile_budget_bytes(vmem_cap))

    # Per-image per-step footprint: 2x(in) + 2x(out) double buffers, plus the
    # f32 pool temporary when the input is narrower than f32.
    per_image_bytes = C * HW * itemsize
    per_image_step = 4 * per_image_bytes + (4 * C * HW if itemsize < 4 else 0)
    nb = _choose_nb(N, per_image_step, budget)

    if nb == 0:
        # A single image's tiles exceed the budget (e.g. huge early-layer maps
        # on v7x's 64 MiB VMEM): stream HW tiles in two phases instead of
        # failing to compile.
        return _se_hw_tiled(x, wd_t, bd, wu_t, bu, budget=budget,
                            vmem_cap=vmem_cap, weight_bytes=weight_bytes)

    # Lane-axis choice: full HW on lanes when 128-aligned (unmasked vst);
    # otherwise put C on lanes (channels-last slab) when C is 128-aligned,
    # which is where RepVGG-style 7x7 / 14x14 SE blocks land.
    channels_last = (HW % 128 != 0) and (C % 128 == 0)
    if channels_last:
        x_flat = jnp.transpose(x, (0, 2, 3, 1)).reshape(N, HW, C)
        blk = (nb, HW, C)
    else:
        x_flat = x.reshape(N, C, HW)
        blk = (nb, C, HW)

    grid = (pl.cdiv(N, nb),)   # non-divisor NB allowed; phantom rows discarded
    needed = nb * per_image_step + 2 * weight_bytes
    vmem_limit = int(max(32 * _MIB,
                         min(needed + 16 * _MIB, min(96 * _MIB, vmem_cap))))

    # TODO(synk): for v7x with N == 1 and a slab that fits VMEM, an HW-split
    # parallel grid would occupy both TensorCores; kept single-pass here since
    # one streaming pass is strictly less HBM traffic than the 2-phase path.

    out_flat = pl.pallas_call(
        _make_se_kernel(channels_last),
        out_shape=jax.ShapeDtypeStruct(x_flat.shape, x.dtype),
        grid_spec=pltpu.PrefetchScalarGridSpec(
            num_scalar_prefetch=0,
            grid=grid,
            in_specs=[
                pl.BlockSpec(blk, lambda n: (n, 0, 0)),
                pl.BlockSpec((C, I), lambda n: (0, 0)),
                pl.BlockSpec((1, I), lambda n: (0, 0)),
                pl.BlockSpec((I, C), lambda n: (0, 0)),
                pl.BlockSpec((1, C), lambda n: (0, 0)),
            ],
            out_specs=pl.BlockSpec(blk, lambda n: (n, 0, 0)),
        ),
        compiler_params=pltpu.CompilerParams(
            dimension_semantics=("parallel",),
            vmem_limit_bytes=vmem_limit,
        ),
        cost_estimate=pl.CostEstimate(
            flops=int(2 * N * C * HW + 4 * N * C * I),
            transcendentals=int(N * C),
            bytes_accessed=int(2 * N * C * HW * itemsize + weight_bytes),
        ),
    )(x_flat, wd_t, bd, wu_t, bu)

    if channels_last:
        return out_flat.reshape(N, H, W, C).transpose(0, 3, 1, 2)
    return out_flat.reshape(N, C, H, W)


def se_block_ref(x, w_down, b_down, w_up, b_up):
    """Pure-JAX reference matching the PyTorch forward."""
    pooled = jnp.mean(x.astype(jnp.float32), axis=(2, 3))                 # (N, C)
    h = jnp.maximum(pooled @ jnp.asarray(w_down, jnp.float32).T
                    + jnp.asarray(b_down, jnp.float32)[None, :], 0.0)     # (N, I)
    s = jax.nn.sigmoid(h @ jnp.asarray(w_up, jnp.float32).T
                       + jnp.asarray(b_up, jnp.float32)[None, :])         # (N, C)
    return (x.astype(jnp.float32) * s[:, :, None, None]).astype(x.dtype)


if __name__ == "__main__":
    root = jax.random.PRNGKey(0)

    def run_case(key, n, c, side, internal, **kwargs):
        k_x, k_wd, k_bd, k_wu, k_bu = jax.random.split(key, 5)
        x = jax.random.normal(k_x, (n, c, side, side), dtype=jnp.float32)
        # Conv2d(kernel_size=1) weights: (out, in, 1, 1) stored as (out, in).
        w_down = jax.random.normal(k_wd, (internal, c), dtype=jnp.float32) * 0.5
        b_down = jax.random.normal(k_bd, (internal,), dtype=jnp.float32) * 0.1
        w_up = jax.random.normal(k_wu, (c, internal), dtype=jnp.float32) * 0.5
        b_up = jax.random.normal(k_bu, (c,), dtype=jnp.float32) * 0.1

        out = jax.block_until_ready(
            se_block(x, w_down, b_down, w_up, b_up, **kwargs))
        ref = se_block_ref(x, w_down, b_down, w_up, b_up)
        assert out.shape == x.shape
        assert jnp.allclose(out, ref, atol=1e-5, rtol=1e-5), (n, c, side, internal)

    k1, k2, k3, k4 = jax.random.split(root, 4)
    # 1) Spec shapes (N=2, C=4, 16x16): HW=256 is 128-aligned -> lane-dense
    #    (N, C, HW) whole-image path, grid length 2.
    run_case(k1, 2, 4, 16, 2)
    # 2) Misaligned HW (7x7=49) with 128-aligned C -> channels-last layout.
    run_case(k2, 2, 128, 7, 8)
    # 3) Oversized-slab fallback (forced via a tiny budget): two-phase HW-tiled
    #    path with a non-128-multiple HW (12x12=144), exercising the masked
    #    pool tail and the discarded padded stores.
    run_case(k3, 1, 8, 12, 4, vmem_budget_override=8 * 1024)
    # 4) Non-divisor NB (N=5, NB=2): padded phantom image in the last grid
    #    block; its garbage gate is discarded on store.
    run_case(k4, 5, 8, 16, 4, vmem_budget_override=100 * 1024)

    print("KERNEL_OK")
</pallas_src>

<mosaic_0001>
module attributes {stable_mosaic.version = 11 : i64} {
  func.func @kernel(%arg0: i32, %arg1: memref<1x4x256xf32, #tpu.memory_space<vmem>>, %arg2: memref<4x2xf32, #tpu.memory_space<vmem>>, %arg3: memref<1x2xf32, #tpu.memory_space<vmem>>, %arg4: memref<2x4xf32, #tpu.memory_space<vmem>>, %arg5: memref<1x4xf32, #tpu.memory_space<vmem>>, %arg6: memref<1x4x256xf32, #tpu.memory_space<vmem>>) attributes {dimension_semantics = [#tpu.dimension_semantics<parallel>], iteration_bounds = array<i64: 2>, scalar_prefetch = 0 : i64, scratch_operands = 0 : i64, tpu.core_type = #tpu.core_type<tc>, window_params = [{transform_indices = @transform_0, window_bounds = array<i64: 1, 4, 256>}, {pipeline_mode = #tpu.pipeline_mode<synchronous>, transform_indices = @transform_1, window_bounds = array<i64: 4, 2>}, {pipeline_mode = #tpu.pipeline_mode<synchronous>, transform_indices = @transform_2, window_bounds = array<i64: 1, 2>}, {pipeline_mode = #tpu.pipeline_mode<synchronous>, transform_indices = @transform_3, window_bounds = array<i64: 2, 4>}, {pipeline_mode = #tpu.pipeline_mode<synchronous>, transform_indices = @transform_4, window_bounds = array<i64: 1, 4>}, {transform_indices = @transform_5, window_bounds = array<i64: 1, 4, 256>}]} {
    %c0 = arith.constant 0 : index
    %c0_0 = arith.constant 0 : index
    %c0_1 = arith.constant 0 : index
    %0 = vector.load %arg1[%c0, %c0_0, %c0_1] : memref<1x4x256xf32, #tpu.memory_space<vmem>>, vector<1x4x256xf32>
    %cst = arith.constant dense<0.000000e+00> : vector<1x4xf32>
    %1 = vector.multi_reduction <add>, %0, %cst [2] : vector<1x4x256xf32> to vector<1x4xf32>
    %cst_2 = arith.constant 2.560000e+02 : f32
    %2 = vector.broadcast %cst_2 : f32 to vector<1x4xf32>
    %3 = arith.divf %1, %2 : vector<1x4xf32>
    %c0_3 = arith.constant 0 : index
    %c0_4 = arith.constant 0 : index
    %4 = vector.load %arg2[%c0_3, %c0_4] : memref<4x2xf32, #tpu.memory_space<vmem>>, vector<4x2xf32>
    %cst_5 = arith.constant dense<0.000000e+00> : vector<1x2xf32>
    %5 = tpu.matmul %3, %4, %cst_5 {dimension_numbers = #tpu.dot_dimension_numbers<[1], [0], [0], [1], [0, 0, 1, 1], [], []>} : vector<1x4xf32>, vector<4x2xf32>, vector<1x2xf32> -> vector<1x2xf32>
    %c0_6 = arith.constant 0 : index
    %c0_7 = arith.constant 0 : index
    %6 = vector.load %arg3[%c0_6, %c0_7] : memref<1x2xf32, #tpu.memory_space<vmem>>, vector<1x2xf32>
    %7 = arith.addf %5, %6 : vector<1x2xf32>
    %cst_8 = arith.constant 0.000000e+00 : f32
    %8 = vector.broadcast %cst_8 : f32 to vector<1x2xf32>
    %9 = arith.maximumf %7, %8 : vector<1x2xf32>
    %c0_9 = arith.constant 0 : index
    %c0_10 = arith.constant 0 : index
    %10 = vector.load %arg4[%c0_9, %c0_10] : memref<2x4xf32, #tpu.memory_space<vmem>>, vector<2x4xf32>
    %cst_11 = arith.constant dense<0.000000e+00> : vector<1x4xf32>
    %11 = tpu.matmul %9, %10, %cst_11 {dimension_numbers = #tpu.dot_dimension_numbers<[1], [0], [0], [1], [0, 0, 1, 1], [], []>} : vector<1x2xf32>, vector<2x4xf32>, vector<1x4xf32> -> vector<1x4xf32>
    %c0_12 = arith.constant 0 : index
    %c0_13 = arith.constant 0 : index
    %12 = vector.load %arg5[%c0_12, %c0_13] : memref<1x4xf32, #tpu.memory_space<vmem>>, vector<1x4xf32>
    %13 = arith.addf %11, %12 : vector<1x4xf32>
    %14 = arith.negf %13 : vector<1x4xf32>
    %15 = math.exp %14 : vector<1x4xf32>
    %cst_14 = arith.constant 1.000000e+00 : f32
    %16 = vector.broadcast %cst_14 : f32 to vector<1x4xf32>
    %17 = arith.addf %16, %15 : vector<1x4xf32>
    %18 = arith.divf %16, %17 : vector<1x4xf32>
    %19 = vector.shape_cast %18 : vector<1x4xf32> to vector<1x4x1xf32>
    %20 = vector.broadcast %19 : vector<1x4x1xf32> to vector<1x4x256xf32>
    %21 = arith.mulf %0, %20 : vector<1x4x256xf32>
    %c0_15 = arith.constant 0 : index
    %c0_16 = arith.constant 0 : index
    %c0_17 = arith.constant 0 : index
    %22 = vector.load %arg6[%c0_15, %c0_16, %c0_17] : memref<1x4x256xf32, #tpu.memory_space<vmem>>, vector<1x4x256xf32>
    tpu.vector_store %arg6[%c0_15, %c0_16, %c0_17], %21 {strides = array<i32>} : memref<1x4x256xf32, #tpu.memory_space<vmem>>, vector<1x4x256xf32>,
    return
  }
  func.func @transform_0(%arg0: i32) -> (i32, i32, i32) {
    %c0_i32 = arith.constant 0 : i32
    %c0_i32_0 = arith.constant 0 : i32
    %c0_i32_1 = arith.constant 0 : i32
    return %arg0, %c0_i32, %c0_i32_0 : i32, i32, i32
  }
  func.func @transform_1(%arg0: i32) -> (i32, i32) {
    %c0_i32 = arith.constant 0 : i32
    %c0_i32_0 = arith.constant 0 : i32
    %c0_i32_1 = arith.constant 0 : i32
    return %c0_i32, %c0_i32_0 : i32, i32
  }
  func.func @transform_2(%arg0: i32) -> (i32, i32) {
    %c0_i32 = arith.constant 0 : i32
    %c0_i32_0 = arith.constant 0 : i32
    %c0_i32_1 = arith.constant 0 : i32
    return %c0_i32, %c0_i32_0 : i32, i32
  }
  func.func @transform_3(%arg0: i32) -> (i32, i32) {
    %c0_i32 = arith.constant 0 : i32
    %c0_i32_0 = arith.constant 0 : i32
    %c0_i32_1 = arith.constant 0 : i32
    return %c0_i32, %c0_i32_0 : i32, i32
  }
  func.func @transform_4(%arg0: i32) -> (i32, i32) {
    %c0_i32 = arith.constant 0 : i32
    %c0_i32_0 = arith.constant 0 : i32
    %c0_i32_1 = arith.constant 0 : i32
    return %c0_i32, %c0_i32_0 : i32, i32
  }
  func.func @transform_5(%arg0: i32) -> (i32, i32, i32) {
    %c0_i32 = arith.constant 0 : i32
    %c0_i32_0 = arith.constant 0 : i32
    %c0_i32_1 = arith.constant 0 : i32
    return %arg0, %c0_i32, %c0_i32_0 : i32, i32, i32
  }
}

</mosaic_0001>

<bundles_post_ra>
// kernel: tpu_custom_call.1
= control target key start
LH: loop header
LB: loop body
LE: loop exit
PB: predicated region body
PF: predicated region fallthrough
CT: control target
= control target key end

     0   :  { %10 = vsyncpa [#allocation3], 0  ;;  %s927_s0 = inlined_call_operand.hbm [shape: f32[2,4,256], index: 0, kind: input, shape index: {}]   ;;  %s928_s1 = inlined_call_operand.vmem [shape: f32[4,2], index: 1, kind: input, shape index: {}]   ;;  %s929_s2 = inlined_call_operand.vmem [shape: f32[1,2], index: 2, kind: input, shape index: {}]   ;;  %s930_s3 = inlined_call_operand.vmem [shape: f32[2,4], index: 3, kind: input, shape index: {}]   ;;  %s931_s4 = inlined_call_operand.vmem [shape: f32[1,4], index: 4, kind: input, shape index: {}]   ;;  %s932_s5 = inlined_call_operand.hbm [shape: f32[2,4,256], index: 5, kind: output, shape index: {}]  }
   0x1   :  { %12 = vsyncpa [#allocation3 + $0x1], 0 }
   0x2   :  { %13 = vsyncpa [#allocation4], 0 }
   0x3   :  { %15 = vsyncpa [#allocation4 + $0x1], 0  ;;  %s750_s18 = smov 0   ;;  %s752_s19 = smov 0  }
   0x4   :  { %s754_s20 = smov 0   ;;  %s756_s21 = smov 0  }
   0x5 LB: > { %s771_s22 = sadd.s32 4294967295, %s713_s21   ;;  %s528_s23 = sadd.s32 4294967294, %s713_s21   ;;  %s713_s21 = sphi %s756_s21, %s947_s21   ;;  %s709_s20 = sphi %s754_s20, %s946_s20   ;;  %s705_s19 = sphi %s752_s19, %s945_s19   ;;  %s701_s18 = sphi %s750_s18, %s944_s18  }
   0x6   : > { %s775_s24 = sadd.s32 1, %s713_s21   ;;  %s28_s25 = sadd.s32 1, %s709_s20 }
   0x7   : > { %s25_s26 = ssub.s32 %s713_s21, %s775_s24  ;;  %p35_p0 = scmp.ne.s32.totalorder %s709_s20, %s705_s19 }
   0x8   : > { %p26_p1 = scmp.eq.s32.totalorder %s25_s26, 0  ;;  %p36_p2 = scmp.eq.s32.totalorder %s713_s21, 0 }
   0x9   : > { %p41_p3 = scmp.ne.s32.totalorder %s705_s19, %s701_s18  ;;  %p42_p4 = scmp.eq.s32.totalorder %s771_s22, 0 }
   0xa   : > { %s787_s27 = scalar_select %p26_p1, %s709_s20, %s28_s25  }
   0xb   : > { %p789_p5 = por %p36_p2, %p35_p0  ;;  %p793_p6 = por %p42_p4, %p41_p3 }
   0xc   : > { %p149_p7 = scmp.eq.s32.totalorder %s771_s22, 1  ;;  %p155_p8 = scmp.eq.s32.totalorder %s528_s23, 1 }
   0xd   : > { %p575_p10 = scmp.lt.s32.totalorder %s713_s21, 2  ;;  %s187_s7 = sand.u32 1, %s709_s20  }
   0xe   : > { %p800_p11 = por %p149_p7, %p35_p0  ;;  %p804_p12 = por %p155_p8, %p41_p3 }
   0xf   : > { %s547_s8 = sshll.u32 %s713_s21, 7  ;;  %s531_s9 = sshll.u32 %s187_s7, 3 }
  0x10   : > { %s936_s30 = scalar_select %p800_p11, 1, 0 }
  0x11   : > { %s937_s6 = scalar_select %p804_p12, 1, 0 }
  0x12   : > { %s813_s12 = scalar_lea.hbm %s927_s0, %s547_s8  ;;  %s191_s13 = scalar_lea.vmem [#allocation2], %s531_s9 }
  0x13   : > { %s199_s14 = sshll.u32 %s191_s13, 4  ;;  %p817_p13 = pnand %p575_p10, %p789_p5  ;;  %s821_s14 = int_to_ptr.vmem [resolvable:$true] %s199_s14 }
  0x14   : > { %s188_s16 = scalar_lea.sflag [#allocation3], %s187_s7  ;;  %s617_s17 = scalar_lea.hbm %s813_s12, 128 }
  0x15   : > { %p618_p2 = scmp.ne.s32.totalorder %s813_s12, %s617_s17  ;;  %p619_p3 = pneg %p817_p13 }
  0x16   : > { %s622_s26 = scalar_lea.hbm %s927_s0, 256  ;;  %p623_p5 = scmp.lt.u32.totalorder %s813_s12, %s927_s0 }
  0x17   : > { %p620_p4 = pnand %p619_p3, %p618_p2  ;;  %p624_p8 = scmp.lt.u32.totalorder %s622_s26, %s617_s17 }
  0x18   : > { %p626_p9 = scmp.lt.u32.totalorder %s617_s17, %s813_s12 }
  0x19   : > { %p621_p7 = pneg %p620_p4  ;;  %p625_p10 = por %p624_p8, %p623_p5 }
  0x1b   : > { %p627_p0 = por %p626_p9, %p625_p10 }
  0x1d   : > { %p628_p1 = pnand %p627_p0, %p621_p7 }
  0x1f   : > { %631 = shalt.err (!%p628_p1)
}
  0x20   : > { %s632_s7 = scalar_lea.vmem %s821_s14, 128  ;;  %s715_s9 = smov [#allocation2]  }
  0x21   : > { %p633_p2 = scmp.ne.s32.totalorder %s821_s14, %s632_s7  ;;  %s637_s10 = sshll.u32 %s715_s9, 4  ;;  %s638_s10 = int_to_ptr.vmem [resolvable:$false] %s637_s10 }
  0x22   : > { %s639_s11 = scalar_lea.vmem %s638_s10, 256  ;;  %p640_p11 = scmp.lt.s32.totalorder %s821_s14, %s638_s10 }
  0x23   : > { %p635_p4 = pnand %p633_p2, %p619_p3  ;;  %p641_p5 = scmp.lt.s32.totalorder %s639_s11, %s632_s7 }
  0x25   : > { %p636_p12 = pneg %p635_p4  ;;  %p642_p8 = por %p641_p5, %p640_p11 }
  0x27   : > { %p643_p9 = pnand %p642_p8, %p636_p12 }
  0x29   : > { %646 = shalt.err (!%p643_p9)
}
  0x2a   : > { %570 = dma.hbm_to_vmem [thread:$0]  (!%p817_p13), %s813_s12, 128, %s821_s14, %s188_s16  }
  0x2b   : > { %p939_p0 = scmp.lt.s32.totalorder %s713_s21, 3  ;;  %p940_p1 = scmp.ge.s32.totalorder %s713_s21, 1 }
  0x2d   : > { %p205_p3 = pnand %p940_p1, %p939_p0 }
  0x2e   : > { %s855_s13 = sand.u32 (!%p205_p3), 1, %s705_s19  }
  0x2f   : > { %208 = sbr.rel (%p205_p3) target bundleno = 798 (0x31e), region = 40  ;;  %s535_s17 = sshll.u32 (!%p205_p3), %s855_s13, 3 }
  0x30   : > { %s211_s23 = scalar_lea.sflag (!%p205_p3), [#allocation3], %s855_s13  ;;  %s214_s15 = scalar_lea.vmem (!%p205_p3), [#allocation2], %s535_s17 }
  0x36   : > { %692 = dma.done.wait (%p793_p6), %s211_s23, 128  }
  0x37   : > { %694 = vsyncadd (%p793_p6), %s211_s23, 4294967168  ;;  %vm245_vm0 = vcmask 1043456   ;;  %v241_v0 = vld [vmem:[%s214_s15] sm:$0xff]  ;;  %v716_v5 = vmov 0.0   ;;  %vm717_vm1 = vmmov 0   ;;  %v256_v7 = vlaneseq  ;;  %s548_s7 = sshll.u32 %s771_s22, 7 }
  0x38   : > { %v243_v1 = vcombine.high %v241_v0, %v241_v0  ;;  %v246_v2 = vsel %vm245_vm0, %v241_v0, 0.0  ;;  %553 = vmatprep.subr.mxu0 %v716_v5  ;;  %v253_v6 = vld [vmem:[%s928_s1] sm:$0xf]  ;;  %558 = vmatprep.subr.mxu1 %v716_v5  ;;  %vm262_vm2 = vcmask 31744   ;;  %vm345_vm3 = vcmask 1041408   ;;  %s240_s9 = scalar_lea.vmem [#allocation5], %s535_s17  ;;  %s883_s15 = scalar_lea.hbm %s932_s5, %s548_s7 }
  0x39   : > { %554 = vmatpush3.msk.msra.mxu0 %vm245_vm0, %v253_v6  ;;  %555 = vmatprep.mubr.msk.f32.mxu0 %vm717_vm1, %v716_v5  ;;  %v257_v8 = vand.u32 127, %v256_v7  ;;  %v259_v9 = vshrl.u32 %v256_v7, 7  ;;  %v339_v14 = vld [vmem:[%s930_s3] sm:$0x3]  ;;  %vm341_vm4 = vcmask 15360   ;;  %s458_s10 = sshll.u32 %s240_s9, 4  ;;  %s885_s10 = int_to_ptr.vmem [resolvable:$true] %s458_s10 }
  0x3a   : > { %v247_v3 = vsel %vm245_vm0, %v243_v1, 0.0  ;;  %560 = vmatprep.mubr.msk.f32.mxu1 %vm717_vm1, %v716_v5  ;;  %559 = vmatpush3.msk.msra.mxu1 %vm345_vm3, %v339_v14  ;;  %v254_v15 = vld [vmem:[%s929_s2] sm:$0x1]  ;;  %v718_v30 = vmov 839922192   ;;  %s444_s12 = scalar_lea.sflag [#allocation4], %s855_s13 }
  0x3b   : > { %v248_v4 = vadd.f32 %v247_v3, %v246_v2  ;;  %v260_v10 = vsub.s32 %v257_v8, %v259_v9  ;;  %v340_v20 = vld [vmem:[%s931_s4] sm:$0x1]  ;;  %v427_v27 = vsub.s32 0, %v259_v9  ;;  %v434_v31 = vunpack.c.l.s4 %v718_v30  ;;  %s647_s14 = scalar_lea.vmem %s885_s10, 128  ;;  %p941_p11 = scmp.ne.s32.totalorder %s936_s30, 0 }
  0x3c   : > { %p648_p6 = scmp.ne.s32.totalorder %s885_s10, %s647_s14  ;;  %s719_s22 = smov [#allocation5]  }
  0x3d   : > { %249 = vadd.xlane.f32.xlu0 %v248_v4  ;;  %v435_v32 = vunpack.c.0.s8 %v434_v31  ;;  %s651_s17 = sshll.u32 %s719_s22, 4  ;;  %s652_s17 = int_to_ptr.vmem [resolvable:$false] %s651_s17 }
  0x3e   : > { %p649_p12 = pnand %p648_p6, %p941_p11  ;;  %s653_s29 = scalar_lea.vmem %s652_s17, 256 }
  0x3f   : > { %v438_v33 = vsub.s32 %v435_v32, %v259_v9  ;;  %p654_p7 = scmp.lt.s32.totalorder %s885_s10, %s652_s17  ;;  %p655_p10 = scmp.lt.s32.totalorder %s653_s29, %s647_s14 }
  0x40   : > { %p650_p13 = pneg %p649_p12 }
  0x41   : > { %p656_p2 = por %p655_p10, %p654_p7 }
  0x43   : > { %p657_p4 = pnand %p656_p2, %p650_p13 }
  0xca   : > { %v250_v11 = vpop.xlane.xlu0 %249 }
  0xcb   : > { %v252_v12 = vmul.f32 0.00390625, %v250_v11 }
  0xcd   : > { %v261_v13 = vrot.slane %v252_v12, %v260_v10 }
  0xcf   : > { %556 = vmatmul.mubr.msk.f32.vlgmr.msra.gmra.mrb[0].mxu0 %vm262_vm2, %v261_v13 }
 0x1a2   : > { %v334_v16 = vpop.f32.mrb[0].mxu0 }
 0x1a3   : > { %v335_v17 = vadd.f32 %v334_v16, %v254_v15  ;;  %v557_v18 = vpop.f32.mrb[1].mxu0 }
 0x1a5   : > { %v338_v19 = vmax.f32 %v335_v17, 0.0 }
 0x1a7   : > { %561 = vmatmul.mubr.msk.f32.vlgmr.msra.gmra.mrb[0].mxu1 %vm341_vm4, %v338_v19 }
 0x27a   : > { %v415_v21 = vpop.f32.mrb[0].mxu1 }
 0x27b   : > { %v416_v22 = vadd.f32 %v415_v21, %v340_v20  ;;  %v562_v23 = vpop.f32.mrb[1].mxu1 }
 0x27d   : > { %v541_v24 = vmul.f32 -1.442695, %v416_v22 }
 0x27f   : > { %613 = vpow2.f32 %v541_v24 }
 0x289   : > { %v614_v25 = vpop.eup %613 }
 0x28a   : > { %v422_v26 = vadd.f32 1.0, %v614_v25 }
 0x28c   : > { %615 = vrcp.f32 %v422_v26 }
 0x296   : > { %v616_v28 = vpop.eup %615 }
 0x297   : > { %v428_v29 = vrot.slane %v616_v28, %v427_v27 }
 0x299   : > { %430 = vbcast.lane.b32.xlu0 %v428_v29, 256 }
 0x30b   : > { %v431_v34 = vpop.permute.xlu0 %430 }
 0x30c   : > { %v439_v35 = vrot.slane %v431_v34, %v438_v33 }
 0x30e   : > { %v441_v36 = vmul.f32 %v439_v35, %v241_v0 }
 0x310   : > { %442 = vst [vmem:[%s240_s9] sm:$0xff] %v441_v36 }
 0x311   : > { %660 = shalt.err (!%p657_p4)
}
 0x312   : > { %s661_s13 = scalar_lea.hbm %s883_s15, 128  ;;  %s665_s26 = scalar_lea.hbm %s932_s5, 256 }
 0x313   : > { %p662_p5 = scmp.ne.s32.totalorder %s883_s15, %s661_s13  ;;  %p666_p0 = scmp.lt.u32.totalorder %s883_s15, %s932_s5 }
 0x314   : > { %p667_p1 = scmp.lt.u32.totalorder %s665_s26, %s661_s13  ;;  %p669_p6 = scmp.lt.u32.totalorder %s661_s13, %s883_s15 }
 0x315   : > { %p663_p8 = pnand %p662_p5, %p941_p11 }
 0x316   : > { %p668_p3 = por %p667_p1, %p666_p0 }
 0x317   : > { %p664_p9 = pneg %p663_p8 }
 0x318   : > { %p670_p12 = por %p669_p6, %p668_p3 }
 0x31a   : > { %p671_p13 = pnand %p670_p12, %p664_p9 }
 0x31c   : > { %674 = shalt.err (!%p671_p13)
}
 0x31d   : > { %565 = dma.vmem_to_hbm [thread:$0]  (%p941_p11), %s885_s10, 128, %s883_s15, %s444_s12  }
 0x31e PF: > { %s470_s7 = sand.u32 1, %s701_s18   ;;  %p942_p7 = scmp.ne.s32.totalorder %s937_s6, 0 }
 0x31f   : > { %p943_p10 = scmp.ge.s32.totalorder %s713_s21, 2  ;;  %s471_s9 = scalar_lea.sflag [#allocation4], %s470_s7 }
 0x321   : > { %p572_p2 = pnand %p943_p10, %p942_p7 }
 0x323   : > { %696 = dma.done.wait (!%p572_p2), %s471_s9, 128  }
 0x324   : > { %698 = vsyncadd (!%p572_p2), %s471_s9, 4294967168  ;;  %p18_p4 = scmp.ge.s32.totalorder %s775_s24, 4   ;;  %s944_s18 = smov %s705_s19 }
 0x325   : > { %s945_s19 = smov %s709_s20  ;;  %s946_s20 = smov %s787_s27 }
 0x326   : > { %s947_s21 = smov %s775_s24  ;;  %20 = sbr.rel (!%p18_p4) target bundleno = 5 (0x5), region = 85 }
 0x32d   :  { %476 = vsyncpa [#allocation3], 1 }
 0x32e   :  { %478 = vsyncpa [#allocation3 + $0x1], 1 }
 0x32f   :  { %479 = vsyncpa [#allocation4], 1 }
 0x330   :  { %481 = vsyncpa [#allocation4 + $0x1], 1 }

</bundles_post_ra>
